<compile_context>
chip_gen: v7x
topology: tpu7x:2x2x1
jax: 0.10.0
libtpu: 0.0.40
codegen_flags: <defaults>
</compile_context>

<pallas_src>
import functools
import numpy as np

import jax
import jax.numpy as jnp
from jax import lax
from jax.experimental import pallas as pl
from jax.experimental.pallas import tpu as pltpu


# --------------------------------------------------------------------------
# helpers
# --------------------------------------------------------------------------
def _round_up(v, m):
    return ((v + m - 1) // m) * m


def _pick_tile(size, candidates):
    for c in candidates:
        if size % c == 0:
            return c
    return size


# --------------------------------------------------------------------------
# Pallas kernel 1: pairwise Euclidean distances  dist[b, i, j] = ||x_bi - y_bj||
# --------------------------------------------------------------------------
def _pair_dist_kernel(x_ref, yt_ref, o_ref):
    x = x_ref[0]          # (TM, F)
    yt = yt_ref[0]        # (F, TN)   (y pre-transposed in the wrapper)
    f = x.shape[1]
    if f > 16:
        # MXU path: ||x||^2 + ||y||^2 - 2 x @ yT, kept in f32 (bf16 operands
        # risk catastrophic cancellation on near-identical rows and can flip
        # path tie-breaks).  TODO(synk): optional bf16 operands for large F.
        xx = jnp.sum(x * x, axis=1, keepdims=True)          # (TM, 1)
        yy = jnp.sum(yt * yt, axis=0, keepdims=True)        # (1, TN)
        xy = lax.dot_general(x, yt, (((1,), (0,)), ((), ())),
                             preferred_element_type=jnp.float32)
        d2 = jnp.maximum(xx + yy - 2.0 * xy, 0.0)
    else:
        # Tiny F: unrolled VPU accumulation on the lane-dense (TM, TN) tile.
        tm = x.shape[0]
        tn = yt.shape[1]
        d2 = jnp.zeros((tm, tn), dtype=jnp.float32)
        for k in range(f):
            diff = x[:, k:k + 1] - yt[k:k + 1, :]            # (TM, TN)
            d2 = d2 + diff * diff
    o_ref[0] = jnp.sqrt(d2)


@functools.lru_cache(maxsize=None)
def _make_pairwise_dist_fn(B, N, M, F):
    Np = _round_up(max(N, 8), 8)
    Mp = _round_up(max(M, 128), 128)
    # Large lane-dense output tiles; (512, 1024) f32 = 2 MiB/tile, well inside
    # even v7x's scoped VMEM with double buffering.
    TM = _pick_tile(Np, (512, 256, 128, 64, 32, 16, 8))
    TN = _pick_tile(Mp, (1024, 512, 256, 128))

    dist_call = pl.pallas_call(
        _pair_dist_kernel,
        out_shape=jax.ShapeDtypeStruct((B, Np, Mp), jnp.float32),
        grid=(B, Np // TM, Mp // TN),
        in_specs=[
            pl.BlockSpec((1, TM, F), lambda b, i, j: (b, i, 0)),
            pl.BlockSpec((1, F, TN), lambda b, i, j: (b, 0, j)),
        ],
        out_specs=pl.BlockSpec((1, TM, TN), lambda b, i, j: (b, i, j)),
        compiler_params=pltpu.CompilerParams(
            dimension_semantics=("parallel", "parallel", "parallel")),
    )

    def fn(x_b, y_b):
        # pad rows/lanes so tiles are full and stores are unmasked vst.
        x_p = jnp.pad(x_b, ((0, 0), (0, Np - N), (0, 0)))
        y_t = jnp.swapaxes(y_b, 1, 2)                        # (B, F, M)
        y_p = jnp.pad(y_t, ((0, 0), (0, 0), (0, Mp - M)))
        # NOTE: output stays padded (B, Np, Mp); the pad region is masked to
        # +inf inside the DP wrapper (saves a full slice pass over HBM here).
        return dist_call(x_p, y_p)

    return jax.jit(fn)


def pairwise_euclidean_padded(x_b, y_b):
    """Returns the padded (B, Np, Mp) distance matrix (pad region is garbage,
    it is masked to +inf inside the DP wrapper)."""
    B, N, F = x_b.shape
    M = y_b.shape[1]
    return _make_pairwise_dist_fn(B, N, M, F)(x_b, y_b)


# --------------------------------------------------------------------------
# Pallas kernel 2: DTW DP as a vectorized anti-diagonal wavefront.
#
# State (per batch item, one sublane each): diag_d[i] = DTW[i, d - i] of the
# (N+1, M+1) DTW table.  Each grid step consumes TD pre-skewed dist diagonals
# (inf outside the matrix / band) and produces TD new DP diagonals:
#   new[i] = dist_diag[i] + min(prev1[i-1], prev1[i], prev2[i-1])
# The i-1 shift is a lane roll (XLU).  Lanes > N (and lane 0 of the dist
# diagonals) are +inf by construction, so the wrapped element of the roll is
# already +inf and no lane-0 masking is needed (Wpad >= N+2 guarantees this).
# --------------------------------------------------------------------------
def _dtw_wavefront_kernel(dist_ref, out_ref, prev2_ref, prev1_ref):
    # dist_ref/out_ref: (1, TD, 8, Wpad)   prev2/prev1: (8, Wpad) VMEM scratch
    w = prev1_ref.shape[-1]
    inf = jnp.float32(jnp.inf)

    @pl.when(pl.program_id(1) == 0)
    def _init():
        # diagonal d=0: only DTW[0,0]=0 ; diagonal d=1: all inf.  (per sublane)
        lane = lax.broadcasted_iota(jnp.int32, (8, w), 1)
        prev2_ref[...] = jnp.where(lane == 0, jnp.float32(0.0), inf)
        prev1_ref[...] = jnp.full((8, w), inf, dtype=jnp.float32)

    td = dist_ref.shape[1]

    def body(t, carry):
        p2 = prev2_ref[...]
        p1 = prev1_ref[...]
        # roll wrap brings lane Wpad-1 into lane 0; it is +inf by construction.
        p1s = pltpu.roll(p1, shift=1, axis=1)
        p2s = pltpu.roll(p2, shift=1, axis=1)
        new = dist_ref[0, t] + jnp.minimum(p1s, jnp.minimum(p1, p2s))
        out_ref[0, t] = new
        prev2_ref[...] = p1
        prev1_ref[...] = new
        return carry

    lax.fori_loop(0, td, body, 0, unroll=True)


# Conservative in+out, double-buffered DP block budget (safe on v7x 64 MiB).
_DP_VMEM_BUDGET = 8 * 1024 * 1024


@functools.lru_cache(maxsize=None)
def _make_dtw_dp_fn(B, N, M, Np, Mp):
    NM1 = N + M - 1                               # diagonals d = 2 .. N+M
    Wpad = _round_up(max(N + 2, 128), 128)        # strictly > N+1 (roll wrap = inf)
    Bp = _round_up(max(B, 8), 8)                  # 8 batch items per sublane group
    G = Bp // 8
    # diagonal chunk: amortize per-grid-step overhead, stay under VMEM budget
    td_cap = max(8, _DP_VMEM_BUDGET // (4 * 4 * 8 * Wpad))
    TD = int(min(64, td_cap, _round_up(NM1, 8)))
    NM1p = _round_up(NM1, TD)

    dp_call = pl.pallas_call(
        _dtw_wavefront_kernel,
        out_shape=jax.ShapeDtypeStruct((G, NM1p, 8, Wpad), jnp.float32),
        grid=(G, NM1p // TD),
        in_specs=[pl.BlockSpec((1, TD, 8, Wpad), lambda g, c: (g, c, 0, 0))],
        out_specs=pl.BlockSpec((1, TD, 8, Wpad), lambda g, c: (g, c, 0, 0)),
        scratch_shapes=[pltpu.VMEM((8, Wpad), jnp.float32),
                        pltpu.VMEM((8, Wpad), jnp.float32)],
        compiler_params=pltpu.CompilerParams(
            dimension_semantics=("parallel", "arbitrary")),
    )

    def fn(dist_pad, mask):
        # dist_pad: (B, Np, Mp) f32 (pad region arbitrary); mask: (B, N, M) bool.
        inf = jnp.float32(np.inf)
        mask_p = jnp.pad(mask, ((0, 0), (0, Np - N), (0, Mp - M)),
                         constant_values=False)
        d = jnp.where(mask_p, dist_pad, inf)                 # band + pad -> inf
        # Skew without gathers: pad each row with Np infs, flatten, re-slice so
        # P[b, i, c] = d[b, i, c-i] (else inf); transpose -> diagonals.
        L = Mp + Np
        padded = jnp.pad(d, ((0, 0), (0, 0), (0, Np)), constant_values=np.inf)
        flat = padded.reshape(B, Np * L)[:, : Np * (L - 1)]
        P = flat.reshape(B, Np, L - 1)
        PT = jnp.swapaxes(P, 1, 2)[:, :NM1, :N]              # (B, NM1, N)
        # lane 0 = inf, lanes 1..N = dist rows, lanes > N = inf, extra inf
        # diagonals + inf batch rows to fill the sublane groups.
        skew = jnp.pad(PT, ((0, Bp - B), (0, NM1p - NM1), (1, Wpad - 1 - N)),
                       constant_values=np.inf)               # (Bp, NM1p, Wpad)
        skew = skew.reshape(G, 8, NM1p, Wpad).transpose(0, 2, 1, 3)
        return dp_call(skew)                                 # (G, NM1p, 8, Wpad)

    return jax.jit(fn)


def dtw_dp_padded(dist_pad, mask_np, N, M):
    """dist_pad: (B, Np, Mp) device f32; mask_np: (B, N, M) bool (True=inside
    band).  Returns the skewed DP table in (G, NM1p, 8, Wpad) layout."""
    B, Np, Mp = dist_pad.shape
    return _make_dtw_dp_fn(B, N, M, Np, Mp)(dist_pad, jnp.asarray(mask_np))


# --------------------------------------------------------------------------
# Host-side glue (data-dependent control flow of FastDTW)
# --------------------------------------------------------------------------
def _reconstruct_dtw(skew_row, n, m):
    """(NM1p, Wpad) skewed DP rows -> (N+1, M+1) DTW table (numpy)."""
    dtw = np.full((n + 1, m + 1), np.inf, dtype=np.float32)
    dtw[0, 0] = 0.0
    ii = np.arange(1, n + 1)[:, None]
    jj = np.arange(1, m + 1)[None, :]
    dtw[1:, 1:] = skew_row[ii + jj - 2, ii]
    return dtw


def _dtw_tables(skew_dev, B, n, m):
    """Device (G, NM1p, 8, Wpad) DP output -> list of numpy DTW tables."""
    skew = np.asarray(jax.device_get(skew_dev))
    return [_reconstruct_dtw(skew[b // 8, :, b % 8, :], n, m) for b in range(B)]


def _extract_optimal_path(dtw_matrix):
    n, m = dtw_matrix.shape
    n -= 1
    m -= 1
    path = [(n, m)]
    while n > 0 or m > 0:
        if n == 0:
            m -= 1
        elif m == 0:
            n -= 1
        else:
            min_val = min(dtw_matrix[n - 1, m], dtw_matrix[n, m - 1],
                          dtw_matrix[n - 1, m - 1])
            if dtw_matrix[n - 1, m - 1] == min_val:
                n -= 1
                m -= 1
            elif dtw_matrix[n - 1, m] == min_val:
                n -= 1
            else:
                m -= 1
        path.append((n, m))
    path.reverse()
    return np.asarray(path, dtype=np.int64)


def _window_mask(path, radius, x_len, y_len):
    """Vectorized equivalent of the reference's window-set expansion."""
    i_high = np.minimum(path[:, 0] * 2, x_len - 1)
    j_high = np.minimum(path[:, 1] * 2, y_len - 1)
    mask = np.zeros((x_len, y_len), dtype=bool)
    for di in range(-radius, radius + 1):
        ii = np.clip(i_high + di, 0, x_len - 1)
        for dj in range(-radius, radius + 1):
            jj = np.clip(j_high + dj, 0, y_len - 1)
            mask[ii, jj] = True
    return mask


def _fastdtw_batched(x_b, y_b, radius):
    """Returns list of (distance, path) per batch item.  One batched distance
    call + one batched DP call per resolution level."""
    B, N, _ = x_b.shape
    M = y_b.shape[1]

    # fine-resolution distances, computed once (cached for the fallback path).
    dist_pad = pairwise_euclidean_padded(x_b, y_b)           # (B, Np, Mp)

    if N <= 2 or M <= 2:
        full = np.ones((B, N, M), dtype=bool)
        tables = _dtw_tables(dtw_dp_padded(dist_pad, full, N, M), B, N, M)
        return [(float(t[N, M]), _extract_optimal_path(t)) for t in tables]

    # recurse on 2x-downsampled sequences (strided, as in the reference)
    low = _fastdtw_batched(x_b[:, ::2], y_b[:, ::2], radius)

    masks = np.zeros((B, N, M), dtype=bool)
    for b in range(B):
        masks[b] = _window_mask(low[b][1], radius, N, M)

    tables = _dtw_tables(dtw_dp_padded(dist_pad, masks, N, M), B, N, M)

    out = [None] * B
    fallback = []
    for b in range(B):
        t = tables[b]
        if np.isfinite(t[N, M]):
            out[b] = (float(t[N, M]), _extract_optimal_path(t))
        else:
            fallback.append(b)

    if fallback:
        # Full (unmasked) DTW only for the failing items, on cached distances.
        idx = jnp.asarray(np.asarray(fallback, dtype=np.int32))
        dist_fb = dist_pad[idx]
        full = np.ones((len(fallback), N, M), dtype=bool)
        tables_fb = _dtw_tables(dtw_dp_padded(dist_fb, full, N, M),
                                len(fallback), N, M)
        for k, b in enumerate(fallback):
            t = tables_fb[k]
            out[b] = (float(t[N, M]), _extract_optimal_path(t))
    return out


class FastDTWPallas:
    """JAX/Pallas re-implementation of the PyTorch FastDTW module's forward."""

    def __init__(self, radius=1, normalize=False):
        self.radius = radius
        self.normalize = normalize

    def __call__(self, x, y=None, return_path=False):
        x = jnp.asarray(x, jnp.float32)
        single = (x.ndim == 2)
        if single:
            x = x[None]
        B = x.shape[0]
        if y is None:
            y = x
        else:
            y = jnp.asarray(y, jnp.float32)
            if y.ndim == 2:
                y = jnp.broadcast_to(y[None], (B,) + y.shape)

        results = _fastdtw_batched(x, y, self.radius)
        dists = np.asarray([r[0] for r in results], dtype=np.float32)
        # normalize applied once at the end (as in the reference forward)
        if self.normalize:
            dists = dists / np.float32(x.shape[1] + y.shape[1])
        paths = [r[1] for r in results]

        if single:
            d = jnp.asarray(dists[0])
            return (d, paths[0]) if return_path else d
        d = jnp.asarray(dists)
        return (d, paths) if return_path else d


if __name__ == "__main__":
    key = jax.random.PRNGKey(0)
    kx, ky = jax.random.split(key)
    B, N, M, F = 2, 8, 8, 4
    x = jax.random.normal(kx, (B, N, F), dtype=jnp.float32)
    y = jax.random.normal(ky, (B, M, F), dtype=jnp.float32)

    # --- unit check: Pallas distance kernel vs numpy ---
    dist_pad = pairwise_euclidean_padded(x, y)
    dist_pl = np.asarray(jax.device_get(dist_pad))[:, :N, :M]
    xn, yn = np.asarray(x, np.float64), np.asarray(y, np.float64)
    dist_ref = np.sqrt(np.sum((xn[:, :, None, :] - yn[:, None, :, :]) ** 2, axis=-1))
    assert np.allclose(dist_pl, dist_ref, rtol=1e-2, atol=5e-2)

    # --- unit check: Pallas wavefront DP (band-masked cell) vs numpy DP ---
    mask = np.ones((B, N, M), dtype=bool)
    mask[:, 0, -1] = False                                 # exercise inf cells
    tables = _dtw_tables(dtw_dp_padded(dist_pad, mask, N, M), B, N, M)
    dist_test = dist_pl.astype(np.float64).copy()
    dist_test[:, 0, -1] = np.inf
    for b in range(B):
        dtw_np = np.full((N + 1, M + 1), np.inf, dtype=np.float64)
        dtw_np[0, 0] = 0.0
        for i in range(1, N + 1):
            for j in range(1, M + 1):
                dtw_np[i, j] = dist_test[b, i - 1, j - 1] + min(
                    dtw_np[i - 1, j], dtw_np[i, j - 1], dtw_np[i - 1, j - 1])
        assert np.allclose(tables[b], dtw_np, rtol=1e-4, atol=1e-4)

    # --- FastDTW forward ---
    model = FastDTWPallas(radius=1, normalize=False)
    distances = model(x, y)
    distances = jax.block_until_ready(distances)
    assert distances.shape == (B,)
    assert bool(jnp.all(jnp.isfinite(distances)))
    print("KERNEL_OK")
</pallas_src>

<mosaic_0001>
module attributes {stable_mosaic.version = 11 : i64} {
  func.func @_pair_dist_kernel(%arg0: i32, %arg1: i32, %arg2: i32, %arg3: memref<1x8x4xf32, #tpu.memory_space<vmem>>, %arg4: memref<1x4x128xf32, #tpu.memory_space<vmem>>, %arg5: memref<1x8x128xf32, #tpu.memory_space<vmem>>) attributes {dimension_semantics = [#tpu.dimension_semantics<parallel>, #tpu.dimension_semantics<parallel>, #tpu.dimension_semantics<parallel>], iteration_bounds = array<i64: 2, 1, 1>, scalar_prefetch = 0 : i64, scratch_operands = 0 : i64, tpu.core_type = #tpu.core_type<tc>, window_params = [{transform_indices = @transform_0, window_bounds = array<i64: 1, 8, 4>}, {transform_indices = @transform_1, window_bounds = array<i64: 1, 4, 128>}, {transform_indices = @transform_2, window_bounds = array<i64: 1, 8, 128>}]} {
    %c0 = arith.constant 0 : index
    %c0_0 = arith.constant 0 : index
    %c0_1 = arith.constant 0 : index
    %0 = vector.load %arg3[%c0, %c0_0, %c0_1] : memref<1x8x4xf32, #tpu.memory_space<vmem>>, vector<1x8x4xf32>
    %1 = vector.shape_cast %0 : vector<1x8x4xf32> to vector<8x4xf32>
    %c0_2 = arith.constant 0 : index
    %c0_3 = arith.constant 0 : index
    %c0_4 = arith.constant 0 : index
    %2 = vector.load %arg4[%c0_2, %c0_3, %c0_4] : memref<1x4x128xf32, #tpu.memory_space<vmem>>, vector<1x4x128xf32>
    %3 = vector.shape_cast %2 : vector<1x4x128xf32> to vector<4x128xf32>
    %cst = arith.constant 0.000000e+00 : f32
    %4 = vector.broadcast %cst : f32 to vector<8x128xf32>
    %5 = vector.extract_strided_slice %1 {offsets = [0, 0], sizes = [8, 1], strides = [1, 1]} : vector<8x4xf32> to vector<8x1xf32>
    %6 = vector.extract_strided_slice %3 {offsets = [0, 0], sizes = [1, 128], strides = [1, 1]} : vector<4x128xf32> to vector<1x128xf32>
    %7 = vector.broadcast %5 : vector<8x1xf32> to vector<8x128xf32>
    %8 = vector.broadcast %6 : vector<1x128xf32> to vector<8x128xf32>
    %9 = arith.subf %7, %8 : vector<8x128xf32>
    %10 = arith.mulf %9, %9 : vector<8x128xf32>
    %11 = arith.addf %4, %10 : vector<8x128xf32>
    %12 = vector.extract_strided_slice %1 {offsets = [0, 1], sizes = [8, 1], strides = [1, 1]} : vector<8x4xf32> to vector<8x1xf32>
    %13 = vector.extract_strided_slice %3 {offsets = [1, 0], sizes = [1, 128], strides = [1, 1]} : vector<4x128xf32> to vector<1x128xf32>
    %14 = vector.broadcast %12 : vector<8x1xf32> to vector<8x128xf32>
    %15 = vector.broadcast %13 : vector<1x128xf32> to vector<8x128xf32>
    %16 = arith.subf %14, %15 : vector<8x128xf32>
    %17 = arith.mulf %16, %16 : vector<8x128xf32>
    %18 = arith.addf %11, %17 : vector<8x128xf32>
    %19 = vector.extract_strided_slice %1 {offsets = [0, 2], sizes = [8, 1], strides = [1, 1]} : vector<8x4xf32> to vector<8x1xf32>
    %20 = vector.extract_strided_slice %3 {offsets = [2, 0], sizes = [1, 128], strides = [1, 1]} : vector<4x128xf32> to vector<1x128xf32>
    %21 = vector.broadcast %19 : vector<8x1xf32> to vector<8x128xf32>
    %22 = vector.broadcast %20 : vector<1x128xf32> to vector<8x128xf32>
    %23 = arith.subf %21, %22 : vector<8x128xf32>
    %24 = arith.mulf %23, %23 : vector<8x128xf32>
    %25 = arith.addf %18, %24 : vector<8x128xf32>
    %26 = vector.extract_strided_slice %1 {offsets = [0, 3], sizes = [8, 1], strides = [1, 1]} : vector<8x4xf32> to vector<8x1xf32>
    %27 = vector.extract_strided_slice %3 {offsets = [3, 0], sizes = [1, 128], strides = [1, 1]} : vector<4x128xf32> to vector<1x128xf32>
    %28 = vector.broadcast %26 : vector<8x1xf32> to vector<8x128xf32>
    %29 = vector.broadcast %27 : vector<1x128xf32> to vector<8x128xf32>
    %30 = arith.subf %28, %29 : vector<8x128xf32>
    %31 = arith.mulf %30, %30 : vector<8x128xf32>
    %32 = arith.addf %25, %31 : vector<8x128xf32>
    %33 = math.sqrt %32 : vector<8x128xf32>
    %c0_5 = arith.constant 0 : index
    %c0_6 = arith.constant 0 : index
    %c0_7 = arith.constant 0 : index
    %34 = vector.load %arg5[%c0_5, %c0_6, %c0_7] : memref<1x8x128xf32, #tpu.memory_space<vmem>>, vector<1x8x128xf32>
    %35 = vector.shape_cast %34 : vector<1x8x128xf32> to vector<8x128xf32>
    %36 = vector.shape_cast %33 : vector<8x128xf32> to vector<1x8x128xf32>
    tpu.vector_store %arg5[%c0_5, %c0_6, %c0_7], %36 {strides = array<i32>} : memref<1x8x128xf32, #tpu.memory_space<vmem>>, vector<1x8x128xf32>,
    return
  }
  func.func @transform_0(%arg0: i32, %arg1: i32, %arg2: i32) -> (i32, i32, i32) {
    %c0_i32 = arith.constant 0 : i32
    %c0_i32_0 = arith.constant 0 : i32
    return %arg0, %arg1, %c0_i32 : i32, i32, i32
  }
  func.func @transform_1(%arg0: i32, %arg1: i32, %arg2: i32) -> (i32, i32, i32) {
    %c0_i32 = arith.constant 0 : i32
    %c0_i32_0 = arith.constant 0 : i32
    return %arg0, %c0_i32, %arg2 : i32, i32, i32
  }
  func.func @transform_2(%arg0: i32, %arg1: i32, %arg2: i32) -> (i32, i32, i32) {
    %c0_i32 = arith.constant 0 : i32
    return %arg0, %arg1, %arg2 : i32, i32, i32
  }
}

</mosaic_0001>

<bundles_post_ra>
// kernel: fn.1
= control target key start
LH: loop header
LB: loop body
LE: loop exit
PB: predicated region body
PF: predicated region fallthrough
CT: control target
= control target key end

     0   :  { %7 = vsyncpa [#allocation3], 0  ;;  %s655_s0 = inlined_call_operand.vmem [shape: f32[2,8,4], index: 0, kind: input, shape index: {}]   ;;  %s656_s1 = inlined_call_operand.vmem [shape: f32[2,4,128], index: 1, kind: input, shape index: {}]   ;;  %s657_s2 = inlined_call_operand.hbm [shape: f32[2,8,128], index: 2, kind: output, shape index: {}]  }
   0x1   :  { %9 = vsyncpa [#allocation3 + $0x1], 0  ;;  %s540_s9 = smov 0   ;;  %s542_s10 = smov 0  }
   0x2   :  { %s544_s11 = smov 0   ;;  %s546_s12 = smov 0  }
   0x3   :  { %s548_s13 = smov 0   ;;  %s550_s14 = smov 0  }
   0x4 LB: > { %s362_s15 = sadd.s32 4294967295, %s518_s14   ;;  %s363_s16 = sadd.s32 4294967294, %s518_s14   ;;  %s518_s14 = sphi %s550_s14, %s15_s14   ;;  %s514_s13 = sphi %s548_s13, %s664_s13   ;;  %s510_s12 = sphi %s546_s12, %s663_s12   ;;  %s506_s11 = sphi %s544_s11, %s662_s11   ;;  %s502_s10 = sphi %s542_s10, %s661_s10   ;;  %s498_s9 = sphi %s540_s9, %s660_s9  }
   0x5   : > { %s34_s17 = sadd.s32 1, %s514_s13  ;;  %s101_s18 = sadd.s32 1, %s506_s11 }
   0x6   : > { %p36_p0 = scmp.ge.s32.totalorder %s34_s17, 2  ;;  %p111_p1 = scmp.ne.s32.totalorder %s506_s11, %s502_s10 }
   0x7   : > { %p112_p2 = scmp.eq.s32.totalorder %s362_s15, 1  ;;  %p117_p3 = scmp.ne.s32.totalorder %s502_s10, %s498_s9 }
   0x8   : > { %s666_s17 = smov (%p36_p0, %s34_s17), 0  ;;  %p118_p5 = scmp.eq.s32.totalorder %s363_s16, 1 }
   0x9   : > { %p580_p4 = por %p112_p2, %p111_p1  ;;  %s94_s20 = ssub.s32 %s514_s13, %s666_s17 }
   0xa   : > { %p366_p6 = scmp.ge.s32.totalorder %s518_s14, 1  ;;  %p99_p7 = scmp.eq.s32.totalorder %s94_s20, 0 }
   0xb   : > { %p587_p8 = por %p118_p5, %p117_p3  ;;  %p156_p9 = scmp.lt.s32.totalorder %s518_s14, 3 }
   0xc   : > { %s593_s22 = scalar_select %p99_p7, %s506_s11, %s101_s18  }
   0xd   : > { %p157_p10 = pnand %p366_p6, %p156_p9 }
   0xe   : > { %p187_p11 = scmp.lt.s32.totalorder (!%p157_p10), %s510_s12, 1  ;;  %v520_v0 = vmov (!%p157_p10), 0   ;;  %v521_v1 = vmov (!%p157_p10), 2   ;;  %v522_v3 = vmov (!%p157_p10), 1   ;;  %v523_v4 = vmov (!%p157_p10), 3   ;;  %s184_s4 = sand.u32 (!%p157_p10), 1, %s502_s10  }
   0xf   : > { %160 = sbr.rel (%p157_p10) target bundleno = 199 (0xc7), region = 28  ;;  %433 = vset.pattern.permute.xlu0 (!%p157_p10), %v520_v0  ;;  %435 = vset.pattern.permute.xlu1 (!%p157_p10), %v521_v1  ;;  %v208_v5 = vlaneseq (!%p157_p10)  ;;  %s367_s5 = sshll.u32 (!%p157_p10), %s184_s4, 3 }
  0x10   : > { %s371_s6 = sshll.u32 (!%p157_p10), %s510_s12, 7  ;;  %s186_s7 = scalar_lea.vmem (!%p157_p10), [#allocation2], %s367_s5 }
  0x11   : > { %v209_v6 = vshrl.u32 (!%p157_p10), %v208_v5, 7  ;;  %s272_s8 = sshll.u32 (!%p157_p10), %s186_s7, 4  ;;  %s608_s18 = scalar_lea.hbm (!%p157_p10), %s657_s2, %s371_s6  ;;  %s610_s8 = int_to_ptr.vmem [resolvable:$true] %s272_s8 }
  0x12   : > { %s440_s20 = scalar_lea.vmem (!%p157_p10), %s610_s8, 128 }
  0x13   : > { %v210_v7 = vsub.s32 (!%p157_p10), 0, %v209_v6  ;;  %v232_v9 = vsub.s32 (!%p157_p10), 2, %v209_v6  ;;  %v221_v10 = vsub.s32 (!%p157_p10), 1, %v209_v6  ;;  %v243_v11 = vsub.s32 (!%p157_p10), 3, %v209_v6  ;;  %p441_p12 = scmp.ne.s32.totalorder (!%p157_p10), %s610_s8, %s440_s20 }
  0x15   : > { %p442_p13 = pnand (!%p157_p10), %p441_p12, %p580_p4 }
  0x16   : > { %s188_s23 = scalar_select %p187_p11, %s510_s12, 1 }
  0x17   : > { %s257_s12 = scalar_lea.sflag [#allocation3], %s184_s4  ;;  %p443_p0 = pneg %p442_p13 }
  0x18   : > { %s368_s24 = sshll.u32 %s188_s23, 3  ;;  %s369_s28 = sshll.u32 %s188_s23, 2 }
  0x19   : > { %s193_s27 = scalar_lea.vmem %s655_s0, %s368_s24  ;;  %s200_s3 = scalar_lea.vmem %s656_s1, %s369_s28 }
  0x1a   : > { %v201_v2 = vld [vmem:[%s193_s27] sm:$0xff]  ;;  %s524_s23 = smov [#allocation2]  }
  0x1b   : > { %205 = vperm.xlu0 %433, %v201_v2   ;;  %227 = vperm.xlu1 %435, %v201_v2   ;;  %v202_v8 = vld [vmem:[%s200_s3] sm:$0xf]  ;;  %s444_s24 = sshll.u32 %s524_s23, 4  ;;  %s445_s24 = int_to_ptr.vmem [resolvable:$false] %s444_s24 }
  0x1c   : > { %v211_v12 = vrot.slane %v202_v8, %v210_v7  ;;  %v233_v15 = vrot.slane %v202_v8, %v232_v9  ;;  %v222_v16 = vrot.slane %v202_v8, %v221_v10  ;;  %v244_v17 = vrot.slane %v202_v8, %v243_v11  ;;  %s446_s25 = scalar_lea.vmem %s445_s24, 256  ;;  %p447_p1 = scmp.lt.s32.totalorder %s610_s8, %s445_s24 }
  0x1d   : > { %p448_p2 = scmp.lt.s32.totalorder %s446_s25, %s440_s20 }
  0x1f   : > { %434 = vset.pattern.permute.xlu0 %v522_v3  ;;  %436 = vset.pattern.permute.xlu1 %v523_v4  ;;  %p449_p3 = por %p448_p2, %p447_p1 }
  0x20   : > { %216 = vperm.xlu0 %434, %v201_v2   ;;  %238 = vperm.xlu1 %436, %v201_v2  }
  0x21   : > { %p450_p5 = pnand %p449_p3, %p443_p0 }
  0x24   : > { %437 = vset.pattern.permute.xlu0 %v523_v4 }
  0x9a   : > { %v206_v13 = vpop.permute.xlu0 %205  ;;  %v228_v14 = vpop.permute.xlu1 %227 }
  0x9b   : > { %v212_v18 = vsub.f32 %v206_v13, %v211_v12  ;;  %v234_v21 = vsub.f32 %v228_v14, %v233_v15 }
  0x9d   : > { %v213_v24 = vmul.f32 %v212_v18, %v212_v18  ;;  %v235_v26 = vmul.f32 %v234_v21, %v234_v21 }
  0x9f   : > { %v217_v19 = vpop.permute.xlu0 %216  ;;  %v239_v20 = vpop.permute.xlu1 %238 }
  0xa0   : > { %v223_v22 = vsub.f32 %v217_v19, %v222_v16  ;;  %v245_v23 = vsub.f32 %v239_v20, %v244_v17 }
  0xa2   : > { %v224_v25 = vmul.f32 %v223_v22, %v223_v22  ;;  %v246_v28 = vmul.f32 %v245_v23, %v245_v23 }
  0xa4   : > { %v225_v27 = vadd.f32 %v224_v25, %v213_v24 }
  0xa6   : > { %v236_v29 = vadd.f32 %v235_v26, %v225_v27 }
  0xa8   : > { %v247_v30 = vadd.f32 %v246_v28, %v236_v29 }
  0xaa   : > { %438 = vrsqrt.f32 %v247_v30  ;;  %vm250_vm0 = vcmp.eq.f32.partialorder %v247_v30, inf  ;;  %v253_v33 = vand.u32 2147483648, %v247_v30  ;;  %vm252_vm1 = vcmp.eq.f32.partialorder %v247_v30, 0.0 }
  0xb4   : > { %v439_v31 = vpop.eup %438 }
  0xb5   : > { %v249_v32 = vmul.f32 %v439_v31, %v247_v30 }
  0xb7   : > { %v251_v34 = vsel %vm250_vm0, %v247_v30, %v249_v32 }
  0xb8   : > { %v254_v35 = vsel %vm252_vm1, %v253_v33, %v251_v34 }
  0xb9   : > { %255 = vst [vmem:[%s186_s7] sm:$0xff] %v254_v35 }
  0xba   : > { %453 = shalt.err (!%p450_p5)
}
  0xbb   : > { %s454_s26 = scalar_lea.hbm %s608_s18, 128  ;;  %s458_s29 = scalar_lea.hbm %s657_s2, 256 }
  0xbc   : > { %p455_p6 = scmp.ne.s32.totalorder %s608_s18, %s454_s26  ;;  %p459_p10 = scmp.lt.u32.totalorder %s608_s18, %s657_s2 }
  0xbd   : > { %p460_p11 = scmp.lt.u32.totalorder %s458_s29, %s454_s26  ;;  %p462_p13 = scmp.lt.u32.totalorder %s454_s26, %s608_s18 }
  0xbe   : > { %p456_p7 = pnand %p455_p6, %p580_p4 }
  0xbf   : > { %p461_p12 = por %p460_p11, %p459_p10 }
  0xc0   : > { %p457_p9 = pneg %p456_p7 }
  0xc1   : > { %p463_p0 = por %p462_p13, %p461_p12 }
  0xc3   : > { %p464_p1 = pnand %p463_p0, %p457_p9 }
  0xc5   : > { %467 = shalt.err (!%p464_p1)
}
  0xc6   : > { %374 = dma.vmem_to_hbm [thread:$0]  (%p580_p4), %s610_s8, 128, %s608_s18, %s257_s12  }
  0xc7 PF: > { %p380_p2 = scmp.ge.s32.totalorder %s518_s14, 2  ;;  %s284_s4 = sand.u32 1, %s498_s9  }
  0xc8   : > { %s285_s5 = scalar_lea.sflag [#allocation3], %s284_s4 }
  0xc9   : > { %p377_p3 = pnand %p380_p2, %p587_p8 }
  0xcb   : > { %493 = dma.done.wait (!%p377_p3), %s285_s5, 128  }
  0xcc   : > { %495 = vsyncadd (!%p377_p3), %s285_s5, 4294967168  ;;  %s15_s14 = sadd.s32 1, %s518_s14   ;;  %s660_s9 = smov %s502_s10 }
  0xcd   : > { %p12_p5 = scmp.ge.s32.totalorder %s15_s14, 4   ;;  %s661_s10 = smov %s506_s11 }
  0xce   : > { %s662_s11 = smov %s593_s22  ;;  %s663_s12 = smov %s514_s13 }
  0xcf   : > { %s664_s13 = smov %s666_s17  ;;  %14 = sbr.rel (!%p12_p5) target bundleno = 4 (0x4), region = 66 }
  0xd6   :  { %290 = vsyncpa [#allocation3], 1 }
  0xd7   :  { %292 = vsyncpa [#allocation3 + $0x1], 1 }

</bundles_post_ra>
